<compile_context>
chip_gen: v6e
topology: v6e:2x2x1
jax: 0.10.0
libtpu: 0.0.40
codegen_flags: <defaults>
</compile_context>

<pallas_src>
import jax
import jax.numpy as jnp
from jax.experimental import pallas as pl
from jax.experimental.pallas import tpu as pltpu


def _matmul_bias_kernel(x_ref, w_ref, b_ref, o_ref):
    # x_ref: [K, TW]   im2col tile (contraction on sublanes, output pixels on lanes)
    # w_ref: [Cout, K] full weight (resident across the spatial axis)
    # b_ref: [Cout, 1] bias, lane-broadcast in the epilogue
    # o_ref: [Cout, TW] lane-dense output tile (NCHW-compatible)
    acc = jnp.dot(w_ref[...], x_ref[...], preferred_element_type=jnp.float32)
    o_ref[...] = (acc + b_ref[...]).astype(o_ref.dtype)


def upsample_conv_layer(
    x_nchw, weight, bias, *, kernel_size, stride, upsample=None, compute_dtype=None
):
    """Forward pass of UpsampleConvLayer.  x_nchw: [N, Cin, H, W] (PyTorch layout).

    compute_dtype: optionally cast matmul operands (e.g. jnp.bfloat16 on v5e);
    accumulation stays f32.  Default keeps the input dtype.
    """
    N, Cin, H, W = x_nchw.shape
    Cout = weight.shape[0]
    KH = KW = kernel_size
    T = KH * KW
    K = T * Cin

    # --- glue (pure index manipulation, fused by XLA into one producer fusion) ---
    # TODO(synk): fold upsample / reflection-pad / tap slicing into the kernel
    # (DMA a padded row tile to VMEM and slice taps in-kernel) to cut the remaining
    # im2col HBM round trip.
    x_in = x_nchw
    if upsample:
        x_in = jnp.repeat(x_in, upsample, axis=2)
        x_in = jnp.repeat(x_in, upsample, axis=3)
    pad = kernel_size // 2
    x_pad = jnp.pad(x_in, ((0, 0), (0, 0), (pad, pad), (pad, pad)), mode="reflect")

    Hp, Wp = x_pad.shape[2], x_pad.shape[3]
    Ho = (Hp - KH) // stride + 1
    Wo = (Wp - KW) // stride + 1
    HoWo = Ho * Wo

    # im2col with channels/taps on sublanes and output pixels on lanes:
    #   x_col[n, t*Cin + c, y*Wo + x] = x_pad[n, c, y*stride + kh, x*stride + kw]
    taps = []
    for kh in range(KH):
        for kw in range(KW):
            sl = x_pad[
                :,
                :,
                kh : kh + (Ho - 1) * stride + 1 : stride,
                kw : kw + (Wo - 1) * stride + 1 : stride,
            ]
            taps.append(sl.reshape(N, Cin, HoWo))
    x_col = jnp.concatenate(taps, axis=1)  # [N, K, HoWo]

    # PyTorch conv weight [Cout, Cin, KH, KW] -> [Cout, K] matching (t, c) order above.
    w2 = jnp.transpose(weight, (0, 2, 3, 1)).reshape(Cout, K)
    b2 = bias.reshape(Cout, 1).astype(jnp.float32)

    if compute_dtype is not None:
        x_col = x_col.astype(compute_dtype)
        w2 = w2.astype(compute_dtype)

    # Tile the output-pixel (lane) axis: multiple of 128, capped at 1024 lanes/tile.
    TW = min(1024, pl.cdiv(HoWo, 128) * 128)
    HoWo_pad = pl.cdiv(HoWo, TW) * TW
    if HoWo_pad != HoWo:
        x_col = jnp.pad(x_col, ((0, 0), (0, 0), (0, HoWo_pad - HoWo)))
    n_sp = HoWo_pad // TW

    out_flat = pl.pallas_call(
        _matmul_bias_kernel,
        out_shape=jax.ShapeDtypeStruct((N, Cout, HoWo_pad), x_nchw.dtype),
        grid_spec=pltpu.PrefetchScalarGridSpec(
            num_scalar_prefetch=0,
            grid=(N, n_sp),
            in_specs=[
                pl.BlockSpec((pl.Squeezed(), K, TW), lambda n, s: (n, 0, s)),
                pl.BlockSpec((Cout, K), lambda n, s: (0, 0)),
                pl.BlockSpec((Cout, 1), lambda n, s: (0, 0)),
            ],
            out_specs=pl.BlockSpec((pl.Squeezed(), Cout, TW), lambda n, s: (n, 0, s)),
        ),
        compiler_params=pltpu.CompilerParams(
            dimension_semantics=("parallel", "parallel"),
            vmem_limit_bytes=32 * 1024 * 1024,
        ),
    )(x_col, w2, b2)

    # Lane-dense [N, Cout, HoWo] is already channel-first; just drop padding + unflatten.
    out = out_flat[:, :, :HoWo].reshape(N, Cout, Ho, Wo)
    return out


def _reference_forward(x_nchw, weight, bias, *, kernel_size, stride, upsample=None):
    """Pure-JAX reference reproducing the PyTorch module (for validation)."""
    x_in = x_nchw
    if upsample:
        x_in = jnp.repeat(x_in, upsample, axis=2)
        x_in = jnp.repeat(x_in, upsample, axis=3)
    pad = kernel_size // 2
    x_pad = jnp.pad(x_in, ((0, 0), (0, 0), (pad, pad), (pad, pad)), mode="reflect")
    out = jax.lax.conv_general_dilated(
        x_pad,
        weight,
        window_strides=(stride, stride),
        padding="VALID",
        dimension_numbers=("NCHW", "OIHW", "NCHW"),
    )
    return out + bias[None, :, None, None]


if __name__ == "__main__":
    # Module config: UpsampleConvLayer(in_channels=4, out_channels=8,
    #                                  kernel_size=3, stride=1, upsample=2)
    N, Cin, H, W = 2, 4, 16, 16
    Cout, Kk, stride, upsample = 8, 3, 1, 2

    key = jax.random.PRNGKey(0)
    kx, kw, kb = jax.random.split(key, 3)
    x = jax.random.normal(kx, (N, Cin, H, W), dtype=jnp.float32)
    weight = 0.1 * jax.random.normal(kw, (Cout, Cin, Kk, Kk), dtype=jnp.float32)
    bias = 0.1 * jax.random.normal(kb, (Cout,), dtype=jnp.float32)

    out = upsample_conv_layer(
        x, weight, bias, kernel_size=Kk, stride=stride, upsample=upsample
    )
    out = jax.block_until_ready(out)

    ref = _reference_forward(
        x, weight, bias, kernel_size=Kk, stride=stride, upsample=upsample
    )
    ref = jax.block_until_ready(ref)

    assert out.shape == (N, Cout, H * upsample, W * upsample), out.shape
    assert jnp.allclose(out, ref, atol=1e-4, rtol=1e-4), float(
        jnp.max(jnp.abs(out - ref))
    )
    print("KERNEL_OK")
</pallas_src>

<mosaic_0001>
module attributes {stable_mosaic.version = 11 : i64} {
  func.func @_matmul_bias_kernel(%arg0: i32, %arg1: i32, %arg2: memref<1x36x1024xf32, #tpu.memory_space<vmem>>, %arg3: memref<8x36xf32, #tpu.memory_space<vmem>>, %arg4: memref<8x1xf32, #tpu.memory_space<vmem>>, %arg5: memref<1x8x1024xf32, #tpu.memory_space<vmem>>) attributes {dimension_semantics = [#tpu.dimension_semantics<parallel>, #tpu.dimension_semantics<parallel>], iteration_bounds = array<i64: 2, 1>, scalar_prefetch = 0 : i64, scratch_operands = 0 : i64, tpu.core_type = #tpu.core_type<tc>, window_params = [{transform_indices = @transform_0, window_bounds = array<i64: 1, 36, 1024>}, {pipeline_mode = #tpu.pipeline_mode<synchronous>, transform_indices = @transform_1, window_bounds = array<i64: 8, 36>}, {pipeline_mode = #tpu.pipeline_mode<synchronous>, transform_indices = @transform_2, window_bounds = array<i64: 8, 1>}, {transform_indices = @transform_3, window_bounds = array<i64: 1, 8, 1024>}]} {
    %c0 = arith.constant 0 : index
    %c0_0 = arith.constant 0 : index
    %0 = vector.load %arg3[%c0, %c0_0] : memref<8x36xf32, #tpu.memory_space<vmem>>, vector<8x36xf32>
    %c0_1 = arith.constant 0 : index
    %c0_2 = arith.constant 0 : index
    %c0_3 = arith.constant 0 : index
    %1 = vector.load %arg2[%c0_1, %c0_2, %c0_3] : memref<1x36x1024xf32, #tpu.memory_space<vmem>>, vector<1x36x1024xf32>
    %2 = vector.shape_cast %1 : vector<1x36x1024xf32> to vector<36x1024xf32>
    %cst = arith.constant dense<0.000000e+00> : vector<8x1024xf32>
    %3 = tpu.matmul %0, %2, %cst {dimension_numbers = #tpu.dot_dimension_numbers<[1], [0], [0], [1], [0, 0, 1, 1], [], []>} : vector<8x36xf32>, vector<36x1024xf32>, vector<8x1024xf32> -> vector<8x1024xf32>
    %c0_4 = arith.constant 0 : index
    %c0_5 = arith.constant 0 : index
    %4 = vector.load %arg4[%c0_4, %c0_5] : memref<8x1xf32, #tpu.memory_space<vmem>>, vector<8x1xf32>
    %5 = vector.broadcast %4 : vector<8x1xf32> to vector<8x1024xf32>
    %6 = arith.addf %3, %5 : vector<8x1024xf32>
    %c0_6 = arith.constant 0 : index
    %c0_7 = arith.constant 0 : index
    %c0_8 = arith.constant 0 : index
    %7 = vector.load %arg5[%c0_6, %c0_7, %c0_8] : memref<1x8x1024xf32, #tpu.memory_space<vmem>>, vector<1x8x1024xf32>
    %8 = vector.shape_cast %7 : vector<1x8x1024xf32> to vector<8x1024xf32>
    %9 = vector.shape_cast %6 : vector<8x1024xf32> to vector<1x8x1024xf32>
    tpu.vector_store %arg5[%c0_6, %c0_7, %c0_8], %9 {strides = array<i32>} : memref<1x8x1024xf32, #tpu.memory_space<vmem>>, vector<1x8x1024xf32>,
    return
  }
  func.func @transform_0(%arg0: i32, %arg1: i32) -> (i32, i32, i32) {
    %c0_i32 = arith.constant 0 : i32
    %c0_i32_0 = arith.constant 0 : i32
    return %arg0, %c0_i32, %arg1 : i32, i32, i32
  }
  func.func @transform_1(%arg0: i32, %arg1: i32) -> (i32, i32) {
    %c0_i32 = arith.constant 0 : i32
    %c0_i32_0 = arith.constant 0 : i32
    %c0_i32_1 = arith.constant 0 : i32
    return %c0_i32, %c0_i32_0 : i32, i32
  }
  func.func @transform_2(%arg0: i32, %arg1: i32) -> (i32, i32) {
    %c0_i32 = arith.constant 0 : i32
    %c0_i32_0 = arith.constant 0 : i32
    %c0_i32_1 = arith.constant 0 : i32
    return %c0_i32, %c0_i32_0 : i32, i32
  }
  func.func @transform_3(%arg0: i32, %arg1: i32) -> (i32, i32, i32) {
    %c0_i32 = arith.constant 0 : i32
    %c0_i32_0 = arith.constant 0 : i32
    return %arg0, %c0_i32, %arg1 : i32, i32, i32
  }
}

</mosaic_0001>

<bundles_post_ra>
// kernel: tpu_custom_call.1
= control target key start
LH: loop header
LB: loop body
LE: loop exit
PB: predicated region body
PF: predicated region fallthrough
CT: control target
= control target key end

     0   :  { %8 = vsyncpa [#allocation3], 0  ;;  %s1019_s0 = inlined_call_operand.vmem [shape: f32[2,36,1024], index: 0, kind: input, shape index: {}]   ;;  %s1020_s1 = inlined_call_operand.vmem [shape: f32[8,36], index: 1, kind: input, shape index: {}]   ;;  %s1021_s2 = inlined_call_operand.vmem [shape: f32[8,1], index: 2, kind: input, shape index: {}]   ;;  %s1022_s3 = inlined_call_operand.hbm [shape: f32[2,8,1024], index: 3, kind: output, shape index: {}]  }
   0x1   :  { %10 = vsyncpa [#allocation3 + $0x1], 0  ;;  %s846_s12 = smov 0   ;;  %s848_s13 = smov 0  }
   0x2   :  { %s850_s14 = smov 0   ;;  %s852_s15 = smov 0  }
   0x3   :  { %s854_s16 = smov 0   ;;  %s856_s17 = smov 0  }
   0x4 LB: > { %s661_s18 = sadd.s32 4294967295, %s821_s17   ;;  %s662_s19 = sadd.s32 4294967294, %s821_s17   ;;  %s821_s17 = sphi %s856_s17, %s16_s17   ;;  %s817_s16 = sphi %s854_s16, %s1029_s16   ;;  %s813_s15 = sphi %s852_s15, %s1028_s15   ;;  %s809_s14 = sphi %s850_s14, %s1027_s14   ;;  %s805_s13 = sphi %s848_s13, %s1026_s13   ;;  %s801_s12 = sphi %s846_s12, %s1025_s12  }
   0x5   : > { %s28_s20 = sadd.s32 1, %s817_s16  ;;  %s107_s21 = sadd.s32 1, %s809_s14 }
   0x6   : > { %p30_p0 = scmp.ge.s32.totalorder %s28_s20, 2  ;;  %p117_p1 = scmp.ne.s32.totalorder %s809_s14, %s805_s13 }
   0x7   : > { %p118_p2 = scmp.eq.s32.totalorder %s661_s18, 1  ;;  %p123_p3 = scmp.ne.s32.totalorder %s805_s13, %s801_s12 }
   0x8   : > { %s1031_s20 = smov (%p30_p0, %s28_s20), 0  ;;  %p124_p5 = scmp.eq.s32.totalorder %s662_s19, 1 }
   0x9   : > { %p886_p4 = por %p118_p2, %p117_p1  ;;  %s102_s23 = ssub.s32 %s817_s16, %s1031_s20 }
   0xa   : > { %p665_p6 = scmp.ge.s32.totalorder %s821_s17, 1  ;;  %p105_p7 = scmp.eq.s32.totalorder %s102_s23, 0 }
   0xb   : > { %p893_p8 = por %p124_p5, %p123_p3  ;;  %p161_p9 = scmp.lt.s32.totalorder %s821_s17, 3 }
   0xc   : > { %s899_s25 = scalar_select %p105_p7, %s809_s14, %s107_s21  }
   0xd   : > { %p162_p10 = pnand %p665_p6, %p161_p9 }
   0xe   : > { %p190_p11 = scmp.lt.s32.totalorder (!%p162_p10), %s813_s15, 1  ;;  %s186_s8 = sand.u32 (!%p162_p10), 1, %s805_s13  }
   0xf   : > { %165 = sbr.rel (%p162_p10) target bundleno = 258 (0x102), region = 32  ;;  %s666_s9 = sshll.u32 (!%p162_p10), %s186_s8, 6 }
  0x10   : > { %s188_s10 = scalar_lea.vmem (!%p162_p10), [#allocation2], %s666_s9  ;;  %s685_s11 = sshll.u32 (!%p162_p10), %s813_s15, 10 }
  0x11   : > { %s585_s18 = sshll.u32 (!%p162_p10), %s188_s10, 4  ;;  %s977_s23 = scalar_lea.hbm (!%p162_p10), %s1022_s3, %s685_s11  ;;  %s586_s18 = int_to_ptr.vmem [resolvable:$true] %s585_s18 }
  0x12   : > { %s745_s26 = scalar_lea.vmem (!%p162_p10), %s586_s18, 1024  ;;  %s825_s27 = smov (!%p162_p10), [#allocation2]  }
  0x13   : > { %p746_p12 = scmp.ne.s32.totalorder (!%p162_p10), %s586_s18, %s745_s26 }
  0x14   : > { %v823_v0 = vmov 0.0   ;;  %v241_v1 = vld [vmem:[%s1021_s2] sm:$0xff]  ;;  %s191_s28 = scalar_select %p190_p11, %s813_s15, 1  ;;  %v824_v2 = vmov 0   ;;  %vm251_vm0 = vcmask 1043456   ;;  %vm247_vm1 = vcmask 293888  }
  0x15   : > { %340 = vmatprep.mubr.f32.mxu0 %v823_v0  ;;  %411 = vmatprep.mubr.f32.mxu1 %v823_v0  ;;  %v200_v23 = vld [vmem:[%s1020_s1] sm:$0xff]  ;;  %s569_s15 = scalar_lea.sflag [#allocation3], %s186_s8  ;;  %p747_p13 = pnand %p746_p12, %p886_p4 }
  0x16   : > { %744 = vset.pattern.permute.xlu0 %v824_v2  ;;  %s686_s29 = smul.u32 320, %s191_s28  ;;  %s749_s28 = sshll.u32 %s825_s27, 4  ;;  %s750_s28 = int_to_ptr.vmem [resolvable:$false] %s749_s28 }
  0x17   : > { %244 = vperm.xlu0 %744, %v241_v1   ;;  %p748_p0 = pneg %p747_p13  ;;  %p752_p1 = scmp.lt.s32.totalorder %s586_s18, %s750_s28 }
  0x18   : > { %s911_s5 = scalar_lea.vmem %s1019_s0, %s686_s29  ;;  %s751_s29 = scalar_lea.vmem %s750_s28, 2048 }
  0x19   : > { %v234_v3 = vld [vmem:[%s911_s5 + $0x108] sm:$0xf]  ;;  %v236_v4 = vld [vmem:[%s911_s5 + $0x118] sm:$0xf]  ;;  %v233_v5 = vld [vmem:[%s911_s5 + $0x100] sm:$0xf]  ;;  %p753_p2 = scmp.lt.s32.totalorder %s751_s29, %s745_s26 }
  0x1a   : > { %668 = vmatprep.subr.msk.mxu0 %vm251_vm0, %v234_v3  ;;  %671 = vmatprep.subr.msk.mxu1 %vm251_vm0, %v236_v4  ;;  %v235_v6 = vld [vmem:[%s911_s5 + $0x110] sm:$0xf]  ;;  %v226_v7 = vld [vmem:[%s911_s5 + $0xc8] sm:$0xff]  ;;  %v228_v8 = vld [vmem:[%s911_s5 + $0xd8] sm:$0xff] }
  0x1b   : > { %669 = vmatpush1.msk.msra.mxu0 %vm251_vm0, %v233_v5  ;;  %672 = vmatpush1.msk.msra.mxu1 %vm251_vm0, %v235_v6  ;;  %v225_v9 = vld [vmem:[%s911_s5 + $0xc0] sm:$0xff]  ;;  %v227_v10 = vld [vmem:[%s911_s5 + $0xd0] sm:$0xff]  ;;  %v218_v11 = vld [vmem:[%s911_s5 + $0x88] sm:$0xff]  ;;  %p754_p3 = por %p753_p2, %p752_p1 }
  0x1c   : > { %300 = vmatprep.subr.mxu0 %v226_v7  ;;  %371 = vmatprep.subr.mxu1 %v228_v8  ;;  %v220_v12 = vld [vmem:[%s911_s5 + $0x98] sm:$0xff]  ;;  %v217_v13 = vld [vmem:[%s911_s5 + $0x80] sm:$0xff]  ;;  %v219_v14 = vld [vmem:[%s911_s5 + $0x90] sm:$0xff] }
  0x1d   : > { %301 = vmatpush1.msra.mxu0 %v225_v9  ;;  %372 = vmatpush1.msra.mxu1 %v227_v10  ;;  %v210_v15 = vld [vmem:[%s911_s5 + $0x48] sm:$0xff]  ;;  %v212_v16 = vld [vmem:[%s911_s5 + $0x58] sm:$0xff]  ;;  %v209_v17 = vld [vmem:[%s911_s5 + $0x40] sm:$0xff]  ;;  %p755_p5 = pnand %p754_p3, %p748_p0 }
  0x1e   : > { %302 = vmatprep.subr.mxu0 %v218_v11  ;;  %373 = vmatprep.subr.mxu1 %v220_v12  ;;  %v211_v18 = vld [vmem:[%s911_s5 + $0x50] sm:$0xff]  ;;  %v202_v19 = vld [vmem:[%s911_s5 + $0x8] sm:$0xff]  ;;  %v204_v20 = vld [vmem:[%s911_s5 + $0x18] sm:$0xff] }
  0x1f   : > { %303 = vmatpush1.msra.mxu0 %v217_v13  ;;  %374 = vmatpush1.msra.mxu1 %v219_v14  ;;  %v201_v21 = vld [vmem:[%s911_s5] sm:$0xff]  ;;  %v203_v22 = vld [vmem:[%s911_s5 + $0x10] sm:$0xff]  ;;  %v238_v24 = vld [vmem:[%s911_s5 + $0x128] sm:$0xf] }
  0x20   : > { %304 = vmatprep.subr.mxu0 %v210_v15  ;;  %375 = vmatprep.subr.mxu1 %v212_v16  ;;  %v240_v25 = vld [vmem:[%s911_s5 + $0x138] sm:$0xf]  ;;  %v237_v26 = vld [vmem:[%s911_s5 + $0x120] sm:$0xf]  ;;  %v239_v27 = vld [vmem:[%s911_s5 + $0x130] sm:$0xf] }
  0x21   : > { %305 = vmatpush1.msra.mxu0 %v209_v17  ;;  %376 = vmatpush1.msra.mxu1 %v211_v18  ;;  %v230_v28 = vld [vmem:[%s911_s5 + $0xe8] sm:$0xff]  ;;  %v232_v29 = vld [vmem:[%s911_s5 + $0xf8] sm:$0xff]  ;;  %v229_v30 = vld [vmem:[%s911_s5 + $0xe0] sm:$0xff] }
  0x22   : > { %306 = vmatprep.subr.mxu0 %v202_v19  ;;  %377 = vmatprep.subr.mxu1 %v204_v20  ;;  %v231_v31 = vld [vmem:[%s911_s5 + $0xf0] sm:$0xff]  ;;  %v222_v32 = vld [vmem:[%s911_s5 + $0xa8] sm:$0xff]  ;;  %v224_v33 = vld [vmem:[%s911_s5 + $0xb8] sm:$0xff] }
  0x23   : > { %307 = vmatpush1.msra.mxu0 %v201_v21  ;;  %378 = vmatpush1.msra.mxu1 %v203_v22  ;;  %v221_v34 = vld [vmem:[%s911_s5 + $0xa0] sm:$0xff]  ;;  %v223_v35 = vld [vmem:[%s911_s5 + $0xb0] sm:$0xff]  ;;  %v214_v36 = vld [vmem:[%s911_s5 + $0x68] sm:$0xff] }
  0x24   : > { %670 = vmatmul.mubr.msk.f32.vlgmr.msra.gmra.mxu0 %vm247_vm1, %v200_v23  ;;  %673 = vmatmul.mubr.msk.f32.vlgmr.msra.gmra.mxu1 %vm247_vm1, %v200_v23  ;;  %v216_v37 = vld [vmem:[%s911_s5 + $0x78] sm:$0xff]  ;;  %v213_v38 = vld [vmem:[%s911_s5 + $0x60] sm:$0xff]  ;;  %v215_v39 = vld [vmem:[%s911_s5 + $0x70] sm:$0xff] }
  0x25   : > { %674 = vmatprep.subr.msk.mxu0 %vm251_vm0, %v238_v24  ;;  %677 = vmatprep.subr.msk.mxu1 %vm251_vm0, %v240_v25  ;;  %v206_v40 = vld [vmem:[%s911_s5 + $0x28] sm:$0xff]  ;;  %v208_v41 = vld [vmem:[%s911_s5 + $0x38] sm:$0xff]  ;;  %v205_v42 = vld [vmem:[%s911_s5 + $0x20] sm:$0xff] }
  0x26   : > { %675 = vmatpush1.msk.msra.mxu0 %vm251_vm0, %v237_v26  ;;  %678 = vmatpush1.msk.msra.mxu1 %vm251_vm0, %v239_v27  ;;  %v207_v43 = vld [vmem:[%s911_s5 + $0x30] sm:$0xff] }
  0x27   : > { %442 = vmatprep.subr.mxu0 %v230_v28  ;;  %513 = vmatprep.subr.mxu1 %v232_v29 }
  0x28   : > { %443 = vmatpush1.msra.mxu0 %v229_v30  ;;  %514 = vmatpush1.msra.mxu1 %v231_v31 }
  0x29   : > { %444 = vmatprep.subr.mxu0 %v222_v32  ;;  %515 = vmatprep.subr.mxu1 %v224_v33 }
  0x2a   : > { %445 = vmatpush1.msra.mxu0 %v221_v34  ;;  %516 = vmatpush1.msra.mxu1 %v223_v35 }
  0x2b   : > { %446 = vmatprep.subr.mxu0 %v214_v36  ;;  %517 = vmatprep.subr.mxu1 %v216_v37 }
  0x2c   : > { %447 = vmatpush1.msra.mxu0 %v213_v38  ;;  %518 = vmatpush1.msra.mxu1 %v215_v39 }
  0x2d   : > { %448 = vmatprep.subr.mxu0 %v206_v40  ;;  %519 = vmatprep.subr.mxu1 %v208_v41 }
  0x2e   : > { %449 = vmatpush1.msra.mxu0 %v205_v42  ;;  %482 = vmatprep.mubr.f32.mxu0 %v823_v0 }
  0x2f   : > { %520 = vmatpush1.msra.mxu1 %v207_v43  ;;  %553 = vmatprep.mubr.f32.mxu1 %v823_v0 }
  0x30   : > { %676 = vmatmul.mubr.msk.f32.vlgmr.msra.gmra.mxu0 %vm247_vm1, %v200_v23  ;;  %679 = vmatmul.mubr.msk.f32.vlgmr.msra.gmra.mxu1 %vm247_vm1, %v200_v23 }
  0x92   : > { %v245_v44 = vpop.permute.xlu0 %244 }
  0xe4   : > { %v342_v45 = vpop.f32.mrf.mxu0  ;;  %v413_v46 = vpop.f32.mrf.mxu1 }
  0xe5   : > { %v343_v47 = vadd.f32 %v342_v45, %v245_v44  ;;  %v414_v48 = vadd.f32 %v413_v46, %v245_v44 }
  0xe6   : > { %v344_v49 = vpop.f32.mrf.mxu0  ;;  %v415_v50 = vpop.f32.mrf.mxu1 }
  0xe7   : > { %560 = vst [vmem:[%s188_s10] sm:$0xff] %v343_v47  ;;  %562 = vst [vmem:[%s188_s10 + $0x10] sm:$0xff] %v414_v48  ;;  %v345_v51 = vadd.f32 %v344_v49, %v245_v44  ;;  %v416_v52 = vadd.f32 %v415_v50, %v245_v44 }
  0xe9   : > { %561 = vst [vmem:[%s188_s10 + $0x8] sm:$0xff] %v345_v51  ;;  %563 = vst [vmem:[%s188_s10 + $0x18] sm:$0xff] %v416_v52 }
  0xf0   : > { %v484_v53 = vpop.f32.mrf.mxu0  ;;  %v555_v54 = vpop.f32.mrf.mxu1 }
  0xf1   : > { %v485_v55 = vadd.f32 %v484_v53, %v245_v44  ;;  %v556_v56 = vadd.f32 %v555_v54, %v245_v44 }
  0xf2   : > { %v486_v57 = vpop.f32.mrf.mxu0  ;;  %v557_v58 = vpop.f32.mrf.mxu1 }
  0xf3   : > { %564 = vst [vmem:[%s188_s10 + $0x20] sm:$0xff] %v485_v55  ;;  %566 = vst [vmem:[%s188_s10 + $0x30] sm:$0xff] %v556_v56  ;;  %v487_v59 = vadd.f32 %v486_v57, %v245_v44  ;;  %v558_v60 = vadd.f32 %v557_v58, %v245_v44 }
  0xf5   : > { %565 = vst [vmem:[%s188_s10 + $0x28] sm:$0xff] %v487_v59  ;;  %567 = vst [vmem:[%s188_s10 + $0x38] sm:$0xff] %v558_v60 }
  0xf6   : > { %758 = shalt.err (!%p755_p5)
}
  0xf7   : > { %s759_s30 = scalar_lea.hbm %s977_s23, 1024  ;;  %s763_s6 = scalar_lea.hbm %s1022_s3, 2048 }
  0xf8   : > { %p760_p6 = scmp.ne.s32.totalorder %s977_s23, %s759_s30  ;;  %p764_p10 = scmp.lt.s32.totalorder %s977_s23, %s1022_s3 }
  0xf9   : > { %p765_p11 = scmp.lt.s32.totalorder %s763_s6, %s759_s30 }
  0xfa   : > { %p761_p7 = pnand %p760_p6, %p886_p4 }
  0xfb   : > { %p766_p12 = por %p765_p11, %p764_p10 }
  0xfc   : > { %p762_p9 = pneg %p761_p7 }
  0xfe   : > { %p767_p13 = pnand %p766_p12, %p762_p9 }
 0x100   : > { %770 = shalt.err (!%p767_p13)
}
 0x101   : > { %687 = dma.vmem_to_hbm [thread:$0]  (%p886_p4), %s586_s18, 1024, %s977_s23, %s569_s15  }
 0x102 PF: > { %p693_p0 = scmp.ge.s32.totalorder %s821_s17, 2  ;;  %s597_s9 = sand.u32 1, %s801_s12  }
 0x103   : > { %s598_s10 = scalar_lea.sflag [#allocation3], %s597_s9 }
 0x104   : > { %p690_p1 = pnand %p693_p0, %p893_p8 }
 0x106   : > { %p691_p2 = pneg %p690_p1 }
 0x108   : > { %796 = dma.done.wait (%p691_p2), %s598_s10, 1024  }
 0x109   : > { %798 = vsyncadd (%p691_p2), %s598_s10, 4294966272  ;;  %s16_s17 = sadd.s32 1, %s821_s17   ;;  %s1025_s12 = smov %s805_s13 }
 0x10a   : > { %p13_p3 = scmp.ge.s32.totalorder %s16_s17, 4   ;;  %s1026_s13 = smov %s809_s14 }
 0x10b   : > { %s1027_s14 = smov %s899_s25  ;;  %s1028_s15 = smov %s817_s16 }
 0x10c   : > { %s1029_s16 = smov %s1031_s20  ;;  %15 = sbr.rel (!%p13_p3) target bundleno = 4 (0x4), region = 67 }
 0x111   :  { %603 = vsyncpa [#allocation3], 1 }
 0x112   :  { %605 = vsyncpa [#allocation3 + $0x1], 1 }

</bundles_post_ra>
